<compile_context>
chip_gen: v5e
topology: v5e:2x2
jax: 0.10.0
libtpu: 0.0.40
codegen_flags: <defaults>
</compile_context>

<pallas_src>
import functools

import jax
import jax.numpy as jnp
from jax.experimental import pallas as pl
from jax.experimental.pallas import tpu as pltpu


def _round_up(v, m):
    return (v + m - 1) // m * m


def _pick_q_tile(n, target):
    """Largest multiple-of-8 divisor of n that is <= target (or n itself if small)."""
    if n <= target:
        return n
    t = (target // 8) * 8
    while t >= 8:
        if n % t == 0:
            return t
        t -= 8
    return 8  # unreachable when n % 8 == 0


def _pick_batch_block(bsz, target):
    t = max(1, min(target, bsz))
    while bsz % t:
        t -= 1
    return t


# ---------------------------------------------------------------------------
# Kernel
# ---------------------------------------------------------------------------
def attention3_kernel(x_ref, wq_ref, wk_ref, bq_ref, bk_ref, o_ref, k_scr,
                      *, approx_reciprocal):
    # x_ref : (Bblk, N, D_pad)  resident across the query-tile axis
    # wq/wk : (D_pad, D_pad)    pre-transposed + pre-cast to the MXU operand dtype
    # bq/bk : (1, D_pad)        f32 (added after f32 accumulation)
    # o_ref : (Bblk, TQ, D_pad)
    # k_scr : (Bblk, N, D_pad)  MXU-dtype VMEM scratch, persists across grid steps
    qi = pl.program_id(1)
    bblk, n, d_pad = x_ref.shape
    tq = o_ref.shape[1]
    mxu_dtype = wq_ref.dtype          # weights arrive already in the MXU operand dtype

    # Project K once per batch block and cache it in VMEM (reused by every q tile).
    @pl.when(qi == 0)
    def _():
        xk = x_ref[...].reshape(bblk * n, d_pad).astype(mxu_dtype)
        kf = jnp.dot(xk, wk_ref[...], preferred_element_type=jnp.float32) + bk_ref[...]
        k_scr[...] = kf.reshape(bblk, n, d_pad).astype(k_scr.dtype)

    # Project the current TQ-row query tile (sliced out of the resident x block).
    q_start = pl.multiple_of(qi * tq, tq)
    xq = x_ref[:, pl.ds(q_start, tq), :]                              # (Bblk, TQ, D_pad)
    qf = jnp.dot(xq.reshape(bblk * tq, d_pad).astype(mxu_dtype), wq_ref[...],
                 preferred_element_type=jnp.float32) + bq_ref[...]
    q = qf.reshape(bblk, tq, d_pad).astype(mxu_dtype)

    # Scores (no 1/sqrt(d) scale — matches the reference forward); f32 softmax stats.
    dots = jnp.einsum('bqd,bkd->bqk', q, k_scr[...],
                      preferred_element_type=jnp.float32)             # (Bblk, TQ, N)
    m = jnp.max(dots, axis=-1, keepdims=True)
    e = jnp.exp(dots - m)
    denom = jnp.sum(e, axis=-1, keepdims=True)                        # (Bblk, TQ, 1)

    # Value matmul on UNNORMALIZED weights, normalize afterwards: N*D_pad multiplies
    # instead of N*N, and the (approx) reciprocal runs on the otherwise-idle EUP slot.
    v = x_ref[...].astype(mxu_dtype)                                  # (Bblk, N, D_pad)
    out_un = jnp.einsum('bqk,bkd->bqd', e.astype(mxu_dtype), v,
                        preferred_element_type=jnp.float32)           # (Bblk, TQ, D_pad)
    inv = pl.reciprocal(denom, approx=approx_reciprocal)
    o_ref[...] = (out_un * inv).astype(o_ref.dtype)


# ---------------------------------------------------------------------------
# One-time parameter / activation prep (NOT in the per-call hot path)
# ---------------------------------------------------------------------------
def attention3_prepare_params(w_qk, b_qk, *, dim, lane=128, matmul_dtype=jnp.float32):
    """Split, transpose, zero-pad (to lane width) and pre-cast the q/k projection.

    w_qk: (2*dim, dim) PyTorch nn.Linear weight.  b_qk: (2*dim,).
    matmul_dtype: MXU operand dtype (weights are stored pre-cast so the kernel never
    re-casts them; pass jnp.bfloat16 on v6e/v7x for higher MXU feed rate).
    Returns (w_q, w_k, b_q, b_k) with shapes (D_pad, D_pad)x2 and (1, D_pad)x2, such
    that x_pad @ w_q + b_q == [q | zeros] (and likewise for k).
    """
    d_pad = _round_up(dim, lane)
    w_qk = jnp.asarray(w_qk, jnp.float32)
    b_qk = jnp.asarray(b_qk, jnp.float32)
    w_q = jnp.zeros((d_pad, d_pad), jnp.float32).at[:dim, :dim].set(w_qk[:dim].T)
    w_k = jnp.zeros((d_pad, d_pad), jnp.float32).at[:dim, :dim].set(w_qk[dim:].T)
    b_q = jnp.zeros((1, d_pad), jnp.float32).at[0, :dim].set(b_qk[:dim])
    b_k = jnp.zeros((1, d_pad), jnp.float32).at[0, :dim].set(b_qk[dim:])
    return w_q.astype(matmul_dtype), w_k.astype(matmul_dtype), b_q, b_k


def pad_features(x, d_pad):
    """One-time lane padding of the feature dim (keep activations padded end-to-end)."""
    d = x.shape[-1]
    if d == d_pad:
        return x
    return jnp.pad(x, [(0, 0)] * (x.ndim - 1) + [(0, d_pad - d)])


# ---------------------------------------------------------------------------
# Wrapper
# ---------------------------------------------------------------------------
def attention3_pallas(x_padded, w_q, w_k, b_q, b_k, *, heads=1,
                      q_tile=256, batch_block=8,
                      approx_reciprocal=True,
                      single_buffer_params=False,
                      vmem_limit_bytes=None):
    """Attention3 forward on lane-padded activations.

    x_padded: (B, N, D_pad) or (N, D_pad) with D_pad = w_q.shape[0] (multiple of 128).
    Returns the lane-padded output; columns >= the original dim are exactly zero, so
    `out[..., :dim]` recovers the module output.  Keeping the padded layout end-to-end
    avoids per-call pad/slice HBM round trips.
    """
    assert heads == 1, "Attention3.forward is only shape-consistent for heads == 1"
    squeeze = x_padded.ndim == 2
    if squeeze:
        x_padded = x_padded[None]
    bsz, n, d_pad = x_padded.shape
    assert d_pad % 128 == 0
    assert w_q.shape == (d_pad, d_pad) and w_k.shape == (d_pad, d_pad)
    assert b_q.shape == (1, d_pad) and b_k.shape == (1, d_pad)
    assert n % 8 == 0, "sequence length must be a multiple of 8 (sublane tile)"
    # TODO(synk): non-multiple-of-8 N needs key masking (padded keys would corrupt the
    # softmax); very large N additionally wants flash-style KV tiling + online softmax.

    tq = _pick_q_tile(n, q_tile)          # use q_tile=128 on v5e (tighter scoped VMEM)
    bblk = _pick_batch_block(bsz, batch_block)
    b_blocks, q_blocks = bsz // bblk, n // tq
    mxu_dtype = w_q.dtype                 # set by attention3_prepare_params

    def const_spec(shape):
        # Constant-index (resident) parameter blocks. On v7x with large D, request a
        # single buffer so the never-changing weights don't eat 2x VMEM.
        if single_buffer_params:
            return pl.BlockSpec(shape, lambda b, q: (0, 0),
                                pipeline_mode=pl.Buffered(1))
        return pl.BlockSpec(shape, lambda b, q: (0, 0))

    grid_spec = pltpu.PrefetchScalarGridSpec(
        num_scalar_prefetch=0,
        grid=(b_blocks, q_blocks),
        in_specs=[
            pl.BlockSpec((bblk, n, d_pad), lambda b, q: (b, 0, 0)),  # x: resident over q tiles
            const_spec((d_pad, d_pad)),                              # W_q
            const_spec((d_pad, d_pad)),                              # W_k
            const_spec((1, d_pad)),                                  # b_q
            const_spec((1, d_pad)),                                  # b_k
        ],
        out_specs=pl.BlockSpec((bblk, tq, d_pad), lambda b, q: (b, q, 0)),
        scratch_shapes=[pltpu.VMEM((bblk, n, d_pad), mxu_dtype)],    # cached K
    )

    act_bytes = x_padded.size * jnp.dtype(x_padded.dtype).itemsize
    w_bytes = (w_q.size + w_k.size) * jnp.dtype(mxu_dtype).itemsize
    cost = pl.CostEstimate(
        flops=bsz * (4 * n * d_pad * d_pad          # q/k projections
                     + 4 * n * n * d_pad),          # scores + value matmuls
        transcendentals=bsz * n * n,                # softmax exp
        bytes_accessed=2 * act_bytes + w_bytes + (b_q.size + b_k.size) * 4,
    )

    kernel = functools.partial(attention3_kernel,
                               approx_reciprocal=approx_reciprocal)
    out = pl.pallas_call(
        kernel,
        out_shape=jax.ShapeDtypeStruct((bsz, n, d_pad), x_padded.dtype),
        grid_spec=grid_spec,
        compiler_params=pltpu.CompilerParams(
            # Batch axis parallel (megacore on v7x); the query-tile axis must stay
            # sequential because the K cache is filled at qi == 0.
            # TODO(synk): for v7x with tiny batch and very large N, drop the K cache
            # and make the q-tile axis the parallel one instead.
            dimension_semantics=("parallel", "arbitrary"),
            vmem_limit_bytes=vmem_limit_bytes,
        ),
        cost_estimate=cost,
    )(x_padded, w_q, w_k, b_q, b_k)

    if squeeze:
        out = out[0]
    return out


# ---------------------------------------------------------------------------
# Pure-JAX reference (mirrors the PyTorch forward, heads == 1)
# ---------------------------------------------------------------------------
def attention3_ref(x, w_qk, b_qk):
    n, dim = x.shape
    qk = x @ w_qk.T + b_qk                      # (N, 2D)
    q, k = qk[:, :dim], qk[:, dim:]             # (N, D) each
    dots = q @ k.T                              # (N, N) -- no 1/sqrt(d) scale
    attn = jax.nn.softmax(dots, axis=-1)
    return attn @ x                             # (N, D)


def xavier_uniform(key, shape):
    fan_out, fan_in = shape
    bound = (6.0 / (fan_in + fan_out)) ** 0.5
    return jax.random.uniform(key, shape, jnp.float32, -bound, bound)


if __name__ == "__main__":
    B, N, DIM, HEADS = 4, 8, 32, 1   # heads=1: the only configuration where the reference forward is valid

    key = jax.random.PRNGKey(0)
    k_x, k_w = jax.random.split(key)

    x = jax.random.normal(k_x, (B, N, DIM), jnp.float32)
    w_qk = xavier_uniform(k_w, (2 * DIM, DIM))        # torch.nn.init.xavier_uniform_
    b_qk = jnp.zeros((2 * DIM,), jnp.float32)         # torch.nn.init.zeros_
    # TODO(synk): self.nn1 (Linear(1024,512)) and self.do1 (Dropout) are unused in forward; not implemented.

    ref = jax.vmap(lambda xi: attention3_ref(xi, w_qk, b_qk))(x)

    D_PAD = _round_up(DIM, 128)
    x_pad = pad_features(x, D_PAD)                    # pad ONCE, outside the hot path

    # --- exact path: f32 MXU operands + exact reciprocal -> tight 1e-5 check ---
    wq32, wk32, bq32, bk32 = attention3_prepare_params(
        w_qk, b_qk, dim=DIM, matmul_dtype=jnp.float32)
    out_pad = attention3_pallas(x_pad, wq32, wk32, bq32, bk32,
                                heads=HEADS, approx_reciprocal=False)
    out_pad = jax.block_until_ready(out_pad)
    out = out_pad[..., :DIM]
    assert out.shape == (B, N, DIM)
    assert jnp.all(out_pad[..., DIM:] == 0), "padded output columns must stay zero"
    assert jnp.allclose(out, ref, atol=1e-5, rtol=1e-5), "mismatch vs JAX reference (f32)"

    # --- production path: bf16 MXU operands + approx reciprocal -> loose check ---
    wqbf, wkbf, bqbf, bkbf = attention3_prepare_params(
        w_qk, b_qk, dim=DIM, matmul_dtype=jnp.bfloat16)
    out_bf = attention3_pallas(x_pad, wqbf, wkbf, bqbf, bkbf,
                               heads=HEADS, approx_reciprocal=True)
    out_bf = jax.block_until_ready(out_bf)[..., :DIM].astype(jnp.float32)
    rel_err = jnp.linalg.norm(out_bf - ref) / jnp.linalg.norm(ref)
    assert rel_err < 0.1, f"bf16 production path too far from reference: {rel_err}"

    print("KERNEL_OK")
</pallas_src>

<mosaic_0001>
module attributes {stable_mosaic.version = 11 : i64} {
  func.func @attention3_kernel(%arg0: i32, %arg1: i32, %arg2: memref<4x8x128xf32, #tpu.memory_space<vmem>>, %arg3: memref<128x128xf32, #tpu.memory_space<vmem>>, %arg4: memref<128x128xf32, #tpu.memory_space<vmem>>, %arg5: memref<1x128xf32, #tpu.memory_space<vmem>>, %arg6: memref<1x128xf32, #tpu.memory_space<vmem>>, %arg7: memref<4x8x128xf32, #tpu.memory_space<vmem>>, %arg8: memref<4x8x128xf32, #tpu.memory_space<vmem>>) attributes {dimension_semantics = [#tpu.dimension_semantics<parallel>, #tpu.dimension_semantics<arbitrary>], iteration_bounds = array<i64: 1, 1>, scalar_prefetch = 0 : i64, scratch_operands = 1 : i64, tpu.core_type = #tpu.core_type<tc>, window_params = [{transform_indices = @transform_0, window_bounds = array<i64: 4, 8, 128>}, {pipeline_mode = #tpu.pipeline_mode<synchronous>, transform_indices = @transform_1, window_bounds = array<i64: 128, 128>}, {pipeline_mode = #tpu.pipeline_mode<synchronous>, transform_indices = @transform_2, window_bounds = array<i64: 128, 128>}, {pipeline_mode = #tpu.pipeline_mode<synchronous>, transform_indices = @transform_3, window_bounds = array<i64: 1, 128>}, {pipeline_mode = #tpu.pipeline_mode<synchronous>, transform_indices = @transform_4, window_bounds = array<i64: 1, 128>}, {transform_indices = @transform_5, window_bounds = array<i64: 4, 8, 128>}]} {
    %c0_i32 = arith.constant 0 : i32
    %0 = arith.cmpi eq, %arg1, %c0_i32 : i32
    %1 = arith.extui %0 : i1 to i32
    %c0_i32_0 = arith.constant 0 : i32
    %2 = arith.cmpi ne, %1, %c0_i32_0 : i32
    scf.if %2 {
      %c0_19 = arith.constant 0 : index
      %c0_20 = arith.constant 0 : index
      %c0_21 = arith.constant 0 : index
      %29 = vector.load %arg2[%c0_19, %c0_20, %c0_21] : memref<4x8x128xf32, #tpu.memory_space<vmem>>, vector<4x8x128xf32>
      %30 = vector.shape_cast %29 : vector<4x8x128xf32> to vector<32x128xf32>
      %c0_22 = arith.constant 0 : index
      %c0_23 = arith.constant 0 : index
      %31 = vector.load %arg4[%c0_22, %c0_23] : memref<128x128xf32, #tpu.memory_space<vmem>>, vector<128x128xf32>
      %cst_24 = arith.constant dense<0.000000e+00> : vector<32x128xf32>
      %32 = tpu.matmul %30, %31, %cst_24 {dimension_numbers = #tpu.dot_dimension_numbers<[1], [0], [0], [1], [0, 0, 1, 1], [], []>} : vector<32x128xf32>, vector<128x128xf32>, vector<32x128xf32> -> vector<32x128xf32>
      %c0_25 = arith.constant 0 : index
      %c0_26 = arith.constant 0 : index
      %33 = vector.load %arg6[%c0_25, %c0_26] : memref<1x128xf32, #tpu.memory_space<vmem>>, vector<1x128xf32>
      %34 = vector.broadcast %33 : vector<1x128xf32> to vector<32x128xf32>
      %35 = arith.addf %32, %34 : vector<32x128xf32>
      %36 = vector.shape_cast %35 : vector<32x128xf32> to vector<4x8x128xf32>
      %c0_27 = arith.constant 0 : index
      %c0_28 = arith.constant 0 : index
      %c0_29 = arith.constant 0 : index
      %37 = vector.load %arg8[%c0_27, %c0_28, %c0_29] : memref<4x8x128xf32, #tpu.memory_space<vmem>>, vector<4x8x128xf32>
      tpu.vector_store %arg8[%c0_27, %c0_28, %c0_29], %36 {strides = array<i32>} : memref<4x8x128xf32, #tpu.memory_space<vmem>>, vector<4x8x128xf32>,
    } else {
    }
    %c8_i32 = arith.constant 8 : i32
    %3 = arith.muli %arg1, %c8_i32 : i32
    %4 = tpu.assume_multiple %3, 8 : i32
    %c0 = arith.constant 0 : index
    %5 = arith.index_cast %4 : i32 to index
    %c0_1 = arith.constant 0 : index
    %6 = vector.load %arg2[%c0, %5, %c0_1] : memref<4x8x128xf32, #tpu.memory_space<vmem>>, vector<4x8x128xf32>
    %7 = vector.shape_cast %6 : vector<4x8x128xf32> to vector<32x128xf32>
    %c0_2 = arith.constant 0 : index
    %c0_3 = arith.constant 0 : index
    %8 = vector.load %arg3[%c0_2, %c0_3] : memref<128x128xf32, #tpu.memory_space<vmem>>, vector<128x128xf32>
    %cst = arith.constant dense<0.000000e+00> : vector<32x128xf32>
    %9 = tpu.matmul %7, %8, %cst {dimension_numbers = #tpu.dot_dimension_numbers<[1], [0], [0], [1], [0, 0, 1, 1], [], []>} : vector<32x128xf32>, vector<128x128xf32>, vector<32x128xf32> -> vector<32x128xf32>
    %c0_4 = arith.constant 0 : index
    %c0_5 = arith.constant 0 : index
    %10 = vector.load %arg5[%c0_4, %c0_5] : memref<1x128xf32, #tpu.memory_space<vmem>>, vector<1x128xf32>
    %11 = vector.broadcast %10 : vector<1x128xf32> to vector<32x128xf32>
    %12 = arith.addf %9, %11 : vector<32x128xf32>
    %13 = vector.shape_cast %12 : vector<32x128xf32> to vector<4x8x128xf32>
    %c0_6 = arith.constant 0 : index
    %c0_7 = arith.constant 0 : index
    %c0_8 = arith.constant 0 : index
    %14 = vector.load %arg8[%c0_6, %c0_7, %c0_8] : memref<4x8x128xf32, #tpu.memory_space<vmem>>, vector<4x8x128xf32>
    "tpu.trace_start"() <{level = 10 : i32, message = "bqd,bkd->bqk"}> : () -> ()
    %cst_9 = arith.constant dense<0.000000e+00> : vector<4x8x8xf32>
    %15 = tpu.matmul %13, %14, %cst_9 {dimension_numbers = #tpu.dot_dimension_numbers<[2], [2], [1], [1], [0, 0, 0, 1, 1, 1], [0], [0]>} : vector<4x8x128xf32>, vector<4x8x128xf32>, vector<4x8x8xf32> -> vector<4x8x8xf32>
    "tpu.trace_stop"() : () -> ()
    %cst_10 = arith.constant dense<0xFF800000> : vector<4x8xf32>
    %16 = vector.multi_reduction <maximumf>, %15, %cst_10 [2] : vector<4x8x8xf32> to vector<4x8xf32>
    %17 = vector.shape_cast %16 : vector<4x8xf32> to vector<4x8x1xf32>
    %18 = vector.broadcast %17 : vector<4x8x1xf32> to vector<4x8x8xf32>
    %19 = arith.subf %15, %18 : vector<4x8x8xf32>
    %20 = math.exp %19 : vector<4x8x8xf32>
    %cst_11 = arith.constant dense<0.000000e+00> : vector<4x8xf32>
    %21 = vector.multi_reduction <add>, %20, %cst_11 [2] : vector<4x8x8xf32> to vector<4x8xf32>
    %22 = vector.shape_cast %21 : vector<4x8xf32> to vector<4x8x1xf32>
    %c0_12 = arith.constant 0 : index
    %c0_13 = arith.constant 0 : index
    %c0_14 = arith.constant 0 : index
    %23 = vector.load %arg2[%c0_12, %c0_13, %c0_14] : memref<4x8x128xf32, #tpu.memory_space<vmem>>, vector<4x8x128xf32>
    "tpu.trace_start"() <{level = 10 : i32, message = "bqk,bkd->bqd"}> : () -> ()
    %cst_15 = arith.constant dense<0.000000e+00> : vector<4x8x128xf32>
    %24 = tpu.matmul %20, %23, %cst_15 {dimension_numbers = #tpu.dot_dimension_numbers<[2], [1], [1], [2], [0, 0, 0, 1, 1, 2], [0], [0]>} : vector<4x8x8xf32>, vector<4x8x128xf32>, vector<4x8x128xf32> -> vector<4x8x128xf32>
    "tpu.trace_stop"() : () -> ()
    %25 = tpu.reciprocal %22 : vector<4x8x1xf32> -> vector<4x8x1xf32>
    %26 = vector.broadcast %25 : vector<4x8x1xf32> to vector<4x8x128xf32>
    %27 = arith.mulf %24, %26 : vector<4x8x128xf32>
    %c0_16 = arith.constant 0 : index
    %c0_17 = arith.constant 0 : index
    %c0_18 = arith.constant 0 : index
    %28 = vector.load %arg7[%c0_16, %c0_17, %c0_18] : memref<4x8x128xf32, #tpu.memory_space<vmem>>, vector<4x8x128xf32>
    tpu.vector_store %arg7[%c0_16, %c0_17, %c0_18], %27 {strides = array<i32>} : memref<4x8x128xf32, #tpu.memory_space<vmem>>, vector<4x8x128xf32>,
    return
  }
  func.func @transform_0(%arg0: i32, %arg1: i32) -> (i32, i32, i32) {
    %c0_i32 = arith.constant 0 : i32
    %c0_i32_0 = arith.constant 0 : i32
    %c0_i32_1 = arith.constant 0 : i32
    return %arg0, %c0_i32, %c0_i32_0 : i32, i32, i32
  }
  func.func @transform_1(%arg0: i32, %arg1: i32) -> (i32, i32) {
    %c0_i32 = arith.constant 0 : i32
    %c0_i32_0 = arith.constant 0 : i32
    %c0_i32_1 = arith.constant 0 : i32
    return %c0_i32, %c0_i32_0 : i32, i32
  }
  func.func @transform_2(%arg0: i32, %arg1: i32) -> (i32, i32) {
    %c0_i32 = arith.constant 0 : i32
    %c0_i32_0 = arith.constant 0 : i32
    %c0_i32_1 = arith.constant 0 : i32
    return %c0_i32, %c0_i32_0 : i32, i32
  }
  func.func @transform_3(%arg0: i32, %arg1: i32) -> (i32, i32) {
    %c0_i32 = arith.constant 0 : i32
    %c0_i32_0 = arith.constant 0 : i32
    %c0_i32_1 = arith.constant 0 : i32
    return %c0_i32, %c0_i32_0 : i32, i32
  }
  func.func @transform_4(%arg0: i32, %arg1: i32) -> (i32, i32) {
    %c0_i32 = arith.constant 0 : i32
    %c0_i32_0 = arith.constant 0 : i32
    %c0_i32_1 = arith.constant 0 : i32
    return %c0_i32, %c0_i32_0 : i32, i32
  }
  func.func @transform_5(%arg0: i32, %arg1: i32) -> (i32, i32, i32) {
    %c0_i32 = arith.constant 0 : i32
    %c0_i32_0 = arith.constant 0 : i32
    return %arg0, %arg1, %c0_i32 : i32, i32, i32
  }
}

</mosaic_0001>

<bundles_post_ra>
// kernel: tpu_custom_call.1
= control target key start
LH: loop header
LB: loop body
LE: loop exit
PB: predicated region body
PF: predicated region fallthrough
CT: control target
= control target key end

     0   :  { %10 = vsyncpa [#allocation4], 0  ;;  %s693_s0 = inlined_call_operand.hbm [shape: f32[4,8,128], index: 0, kind: input, shape index: {}]   ;;  %s694_s1 = inlined_call_operand.hbm [shape: f32[128,128], index: 1, kind: input, shape index: {}]   ;;  %s695_s2 = inlined_call_operand.hbm [shape: f32[128,128], index: 2, kind: input, shape index: {}]   ;;  %s696_s3 = inlined_call_operand.vmem [shape: f32[1,128], index: 3, kind: input, shape index: {}]   ;;  %s697_s4 = inlined_call_operand.vmem [shape: f32[1,128], index: 4, kind: input, shape index: {}]   ;;  %s698_s5 = inlined_call_operand.hbm [shape: f32[4,8,128], index: 5, kind: output, shape index: {}]  }
   0x1   :  { %11 = vsyncpa [#allocation7], 0 }
   0x2   :  { %12 = vsyncpa [#allocation5], 0  ;;  %s30_s20 = sshll.u32 %s694_s1, 4  ;;  %s615_s21 = smov [#allocation6]   ;;  %s31_s20 = int_to_ptr.hbm [resolvable:$true] %s30_s20 }
   0x3   :  { %s32_s22 = sshll.u32 %s615_s21, 4  ;;  %s17_s25 = sshll.u32 %s693_s0, 4  ;;  %s33_s22 = int_to_ptr.vmem [resolvable:$true] %s32_s22  ;;  %s18_s25 = int_to_ptr.hbm [resolvable:$true] %s17_s25 }
   0x4   :  { %s616_s26 = smov 128   ;;  %s617_s27 = smov 8  }
   0x5   :  { %38 = dma.hbm_to_vmem [thread:$0]  %s31_s20, 2048, %s33_s22, [#allocation7], %s616_s26, %s616_s26, %s617_s27  }
   0x6   :  { %s618_s28 = smov [#allocation3]   ;;  %s43_s1 = sshll.u32 %s695_s2, 4  ;;  %s44_s1 = int_to_ptr.hbm [resolvable:$true] %s43_s1 }
   0x7   :  { %s19_s29 = sshll.u32 %s618_s28, 4  ;;  %s619_s0 = smov [#allocation8]   ;;  %s20_s29 = int_to_ptr.vmem [resolvable:$true] %s19_s29 }
   0x8   :  { %25 = dma.hbm_to_vmem [thread:$0]  %s18_s25, 512, %s20_s29, [#allocation4], %s616_s26, %s616_s26, %s617_s27  }
   0x9   :  { %s45_s7 = sshll.u32 %s619_s0, 4  ;;  %s46_s7 = int_to_ptr.vmem [resolvable:$true] %s45_s7 }
   0xa   :  { %51 = dma.hbm_to_vmem [thread:$0]  %s44_s1, 2048, %s46_s7, [#allocation7], %s616_s26, %s616_s26, %s617_s27  }
   0xb   :  { %609 = dma.done.wait [#allocation4], 512  }
   0xc   :  { %610 = vsyncadd [#allocation4], 4294966784 }
   0xd   :  { %611 = dma.done.wait [#allocation7], 4096  }
   0xe   :  { %612 = vsyncadd [#allocation7], 4294963200  ;;  %v91_v0 = vld [vmem:[#allocation8 + $0x78] sm:$0xff]  ;;  %v90_v1 = vld [vmem:[#allocation8 + $0x70] sm:$0xff]  ;;  %vm268_vm0 = vcmask 64512   ;;  %s471_s13 = sshll.u32 %s698_s5, 4  ;;  %s472_s13 = int_to_ptr.hbm [resolvable:$true] %s471_s13 }
   0xf   :  { %v150_v2 = vld [vmem:[#allocation6 + $0x78] sm:$0xff]  ;;  %96 = vmatpush.msra.mxu0 %v91_v0  ;;  %v149_v3 = vld [vmem:[#allocation6 + $0x70] sm:$0xff]  ;;  %v89_v4 = vld [vmem:[#allocation8 + $0x68] sm:$0xff] }
  0x10   :  { %155 = vmatpush.msra.mxu1 %v150_v2  ;;  %v148_v5 = vld [vmem:[#allocation6 + $0x68] sm:$0xff]  ;;  %v88_v6 = vld [vmem:[#allocation8 + $0x60] sm:$0xff]  ;;  %v87_v8 = vld [vmem:[#allocation8 + $0x58] sm:$0xff] }
  0x11   :  { %97 = vmatpush.msra.mxu0 %v90_v1  ;;  %v147_v7 = vld [vmem:[#allocation6 + $0x60] sm:$0xff]  ;;  %v146_v9 = vld [vmem:[#allocation6 + $0x58] sm:$0xff]  ;;  %v86_v10 = vld [vmem:[#allocation8 + $0x50] sm:$0xff] }
  0x12   :  { %156 = vmatpush.msra.mxu1 %v149_v3  ;;  %v145_v11 = vld [vmem:[#allocation6 + $0x50] sm:$0xff]  ;;  %v85_v12 = vld [vmem:[#allocation8 + $0x48] sm:$0xff]  ;;  %v84_v14 = vld [vmem:[#allocation8 + $0x40] sm:$0xff] }
  0x13   :  { %98 = vmatpush.msra.mxu0 %v89_v4  ;;  %v144_v13 = vld [vmem:[#allocation6 + $0x48] sm:$0xff]  ;;  %v143_v15 = vld [vmem:[#allocation6 + $0x40] sm:$0xff]  ;;  %v83_v16 = vld [vmem:[#allocation8 + $0x38] sm:$0xff] }
  0x14   :  { %157 = vmatpush.msra.mxu1 %v148_v5  ;;  %v142_v17 = vld [vmem:[#allocation6 + $0x38] sm:$0xff]  ;;  %v82_v18 = vld [vmem:[#allocation8 + $0x30] sm:$0xff]  ;;  %v81_v20 = vld [vmem:[#allocation8 + $0x28] sm:$0xff] }
  0x15   :  { %99 = vmatpush.msra.mxu0 %v88_v6  ;;  %v141_v19 = vld [vmem:[#allocation6 + $0x30] sm:$0xff]  ;;  %v140_v21 = vld [vmem:[#allocation6 + $0x28] sm:$0xff]  ;;  %v80_v22 = vld [vmem:[#allocation8 + $0x20] sm:$0xff] }
  0x16   :  { %158 = vmatpush.msra.mxu1 %v147_v7  ;;  %v139_v23 = vld [vmem:[#allocation6 + $0x20] sm:$0xff]  ;;  %v79_v24 = vld [vmem:[#allocation8 + $0x18] sm:$0xff]  ;;  %v78_v26 = vld [vmem:[#allocation8 + $0x10] sm:$0xff] }
  0x17   :  { %100 = vmatpush.msra.mxu0 %v87_v8  ;;  %v138_v25 = vld [vmem:[#allocation6 + $0x18] sm:$0xff]  ;;  %v137_v27 = vld [vmem:[#allocation6 + $0x10] sm:$0xff]  ;;  %v77_v28 = vld [vmem:[#allocation8 + $0x8] sm:$0xff] }
  0x18   :  { %159 = vmatpush.msra.mxu1 %v146_v9  ;;  %v136_v29 = vld [vmem:[#allocation6 + $0x8] sm:$0xff]  ;;  %v76_v30 = vld [vmem:[#allocation8] sm:$0xff]  ;;  %v74_v34 = vld [vmem:[#allocation3 + $0x10] sm:$0xff] }
  0x19   :  { %101 = vmatpush.msra.mxu0 %v86_v10  ;;  %v135_v31 = vld [vmem:[#allocation6] sm:$0xff]  ;;  %v73_v33 = vld [vmem:[#allocation3 + $0x8] sm:$0xff]  ;;  %v75_v35 = vld [vmem:[#allocation3 + $0x18] sm:$0xff] }
  0x1a   :  { %160 = vmatpush.msra.mxu1 %v145_v11  ;;  %v72_v32 = vld [vmem:[#allocation3] sm:$0xff] }
  0x1b   :  { %102 = vmatpush.msra.mxu0 %v85_v12  ;;  %v496_v36 = vld [vmem:[%s697_s4] ss:$0 sm:$0xff] }
  0x1c   :  { %161 = vmatpush.msra.mxu1 %v144_v13  ;;  %v495_v37 = vld [vmem:[%s696_s3] ss:$0 sm:$0xff]  ;;  %s620_s3 = smov [#allocation9]  }
  0x1d   :  { %103 = vmatpush.msra.mxu0 %v84_v14  ;;  %s469_s4 = sshll.u32 %s620_s3, 4  ;;  %s470_s4 = int_to_ptr.vmem [resolvable:$true] %s469_s4 }
  0x1e   :  { %162 = vmatpush.msra.mxu1 %v143_v15 }
  0x1f   :  { %104 = vmatpush.msra.mxu0 %v83_v16 }
  0x20   :  { %163 = vmatpush.msra.mxu1 %v142_v17 }
  0x21   :  { %105 = vmatpush.msra.mxu0 %v82_v18 }
  0x22   :  { %164 = vmatpush.msra.mxu1 %v141_v19 }
  0x23   :  { %106 = vmatpush.msra.mxu0 %v81_v20 }
  0x24   :  { %165 = vmatpush.msra.mxu1 %v140_v21 }
  0x25   :  { %107 = vmatpush.msra.mxu0 %v80_v22 }
  0x26   :  { %166 = vmatpush.msra.mxu1 %v139_v23 }
  0x27   :  { %108 = vmatpush.msra.mxu0 %v79_v24 }
  0x28   :  { %167 = vmatpush.msra.mxu1 %v138_v25 }
  0x29   :  { %109 = vmatpush.msra.mxu0 %v78_v26 }
  0x2a   :  { %168 = vmatpush.msra.mxu1 %v137_v27 }
  0x2b   :  { %110 = vmatpush.msra.mxu0 %v77_v28 }
  0x2c   :  { %169 = vmatpush.msra.mxu1 %v136_v29 }
  0x2d   :  { %111 = vmatpush.msra.mxu0 %v76_v30 }
  0x2e   :  { %170 = vmatpush.msra.mxu1 %v135_v31  ;;  %112 = vmatmul.f32.vlgmr.msra.gmra.mxu0 %v72_v32 }
  0x2f   :  { %171 = vmatmul.f32.vlgmr.msra.gmra.mxu1 %v72_v32 }
  0x36   :  { %115 = vmatmul.f32.gmra.mxu0 %v73_v33 }
  0x37   :  { %174 = vmatmul.f32.gmra.mxu1 %v73_v33 }
  0x3e   :  { %118 = vmatmul.f32.gmra.mxu0 %v74_v34 }
  0x3f   :  { %177 = vmatmul.f32.gmra.mxu1 %v74_v34 }
  0x46   :  { %121 = vmatmul.f32.gmra.mxu0 %v75_v35 }
  0x47   :  { %180 = vmatmul.f32.gmra.mxu1 %v75_v35 }
  0xab   :  { %v113_v38 = vpop.f32.mrf.mxu0 }
  0xac   :  { %v172_v39 = vpop.f32.mrf.mxu1  ;;  %v114_v40 = vadd.f32 %v496_v36, %v113_v38 }
  0xad   :  { %v173_v41 = vadd.f32 %v495_v37, %v172_v39 }
  0xae   :  { %203 = vmatpush.xpose.msra.mxu2 %v114_v40 }
  0xb1   :  { %204 = vmatmul.f32.vlgmr.msra.gmra.mxu2 %v173_v41 }
  0xb3   :  { %v116_v42 = vpop.f32.mrf.mxu0 }
  0xb4   :  { %v175_v43 = vpop.f32.mrf.mxu1  ;;  %v117_v44 = vadd.f32 %v496_v36, %v116_v42 }
  0xb5   :  { %v176_v45 = vadd.f32 %v495_v37, %v175_v43 }
  0xb6   :  { %223 = vmatpush.xpose.msra.mxu3 %v117_v44 }
  0xb9   :  { %224 = vmatmul.f32.vlgmr.msra.gmra.mxu3 %v176_v45 }
  0xbb   :  { %v119_v46 = vpop.f32.mrf.mxu0 }
  0xbc   :  { %v178_v47 = vpop.f32.mrf.mxu1  ;;  %v120_v48 = vadd.f32 %v496_v36, %v119_v46 }
  0xbd   :  { %v179_v49 = vadd.f32 %v495_v37, %v178_v47 }
  0xbe   :  { %243 = vmatpush.xpose.msrb.mxu2 %v120_v48 }
  0xc1   :  { %244 = vmatmul.f32.vlgmr.msrb.gmra.mxu2 %v179_v49 }
  0xc2   :  { %327 = vmatpush.msra.mxu2 %v72_v32 }
  0xc3   :  { %v122_v50 = vpop.f32.mrf.mxu0 }
  0xc4   :  { %373 = vmatpush.msrb.mxu2 %v74_v34  ;;  %v181_v51 = vpop.f32.mrf.mxu1  ;;  %v123_v52 = vadd.f32 %v496_v36, %v122_v50 }
  0xc5   :  { %v182_v53 = vadd.f32 %v495_v37, %v181_v51 }
  0xc6   :  { %263 = vmatpush.xpose.msrb.mxu3 %v123_v52 }
  0xc9   :  { %264 = vmatmul.f32.vlgmr.msrb.gmra.mxu3 %v182_v53 }
  0xca   :  { %350 = vmatpush.msra.mxu3 %v73_v33 }
  0xcc   :  { %396 = vmatpush.msrb.mxu3 %v75_v35 }
 0x134   :  { %v205_v54 = vpop.f32.mrf.mxu2 }
 0x135   :  { %v269_v55 = vsel %vm268_vm0, %v205_v54, -inf }
 0x136   :  { %270 = vmax.xlane.f32.xlu0 %v269_v55 }
 0x13c   :  { %v225_v56 = vpop.f32.mrf.mxu3 }
 0x13d   :  { %v272_v57 = vsel %vm268_vm0, %v225_v56, -inf }
 0x13e   :  { %273 = vmax.xlane.f32.xlu0 %v272_v57 }
 0x144   :  { %v245_v58 = vpop.f32.mrf.mxu2 }
 0x145   :  { %v275_v59 = vsel %vm268_vm0, %v245_v58, -inf }
 0x146   :  { %276 = vmax.xlane.f32.xlu1 %v275_v59 }
 0x14c   :  { %v265_v60 = vpop.f32.mrf.mxu3 }
 0x14d   :  { %v278_v61 = vsel %vm268_vm0, %v265_v60, -inf }
 0x14e   :  { %279 = vmax.xlane.f32.xlu1 %v278_v61 }
 0x1a9   :  { %v271_v62 = vpop.xlane.xlu0 %270 }
 0x1aa   :  { %v281_v63 = vsub.f32 %v205_v54, %v271_v62 }
 0x1ac   :  { %v285_v0 = vmul.f32 1.442695, %v281_v63 }
 0x1ae   :  { %497 = vpow2.f32 %v285_v0 }
 0x1b1   :  { %v274_v1 = vpop.xlane.xlu0 %273 }
 0x1b2   :  { %v282_v2 = vsub.f32 %v225_v56, %v274_v1 }
 0x1b4   :  { %v498_v3 = vpop.eup %497  ;;  %v287_v4 = vmul.f32 1.442695, %v282_v2 }
 0x1b5   :  { %485 = vmatmul.msk.f32.vlgmr.msra.gmra.mxu2 %vm268_vm0, %v498_v3  ;;  %v293_v5 = vsel %vm268_vm0, %v498_v3, 0.0 }
 0x1b6   :  { %499 = vpow2.f32 %v287_v4  ;;  %294 = vadd.xlane.f32.xlu2 %v293_v5 }
 0x1b9   :  { %v277_v6 = vpop.xlane.xlu1 %276 }
 0x1ba   :  { %v283_v7 = vsub.f32 %v245_v58, %v277_v6 }
 0x1bc   :  { %v500_v8 = vpop.eup %499  ;;  %v289_v9 = vmul.f32 1.442695, %v283_v7 }
 0x1bd   :  { %486 = vmatmul.msk.f32.vlgmr.msra.gmra.mxu3 %vm268_vm0, %v500_v8  ;;  %v296_v10 = vsel %vm268_vm0, %v500_v8, 0.0 }
 0x1be   :  { %501 = vpow2.f32 %v289_v9  ;;  %297 = vadd.xlane.f32.xlu2 %v296_v10 }
 0x1c1   :  { %v280_v11 = vpop.xlane.xlu1 %279 }
 0x1c2   :  { %v284_v12 = vsub.f32 %v265_v60, %v280_v11 }
 0x1c4   :  { %v502_v13 = vpop.eup %501  ;;  %v291_v14 = vmul.f32 1.442695, %v284_v12 }
 0x1c5   :  { %487 = vmatmul.msk.f32.vlgmr.msrb.gmra.mxu2 %vm268_vm0, %v502_v13  ;;  %v299_v15 = vsel %vm268_vm0, %v502_v13, 0.0 }
 0x1c6   :  { %503 = vpow2.f32 %v291_v14  ;;  %300 = vadd.xlane.f32.xlu0 %v299_v15 }
 0x1cc   :  { %v504_v16 = vpop.eup %503 }
 0x1cd   :  { %488 = vmatmul.msk.f32.vlgmr.msrb.gmra.mxu3 %vm268_vm0, %v504_v16  ;;  %v302_v17 = vsel %vm268_vm0, %v504_v16, 0.0 }
 0x1ce   :  { %303 = vadd.xlane.f32.xlu1 %v302_v17 }
 0x229   :  { %v295_v18 = vpop.xlane.xlu2 %294 }
 0x22a   :  { %505 = vrcp.f32 %v295_v18  ;;  %v412_v23 = vand.u32 2147483648, %v295_v18  ;;  %v410_v25 = vand.u32 2147483647, %v295_v18  ;;  %vm406_vm2 = vweird.f32 %v295_v18 }
 0x22c   :  { %v413_v28 = vor.u32 1.1754944e-38, %v412_v23  ;;  %vm411_vm4 = vcmp.eq.f32.partialorder %v410_v25, 8.507059e+37 }
 0x230   :  { %v506_v19 = vpop.eup %505 }
 0x231   :  { %v402_v20 = vmul.f32 %v506_v19, %v295_v18  ;;  %v298_v21 = vpop.xlane.xlu2 %297  ;;  %vm407_vm1 = vweird.f32 %v506_v19 }
 0x232   :  { %507 = vrcp.f32 %v298_v21  ;;  %vm408_vm3 = vmor %vm406_vm2, %vm407_vm1  ;;  %v426_v36 = vand.u32 2147483648, %v298_v21  ;;  %v424_v38 = vand.u32 2147483647, %v298_v21  ;;  %vm420_vm6 = vweird.f32 %v298_v21 }
 0x233   :  { %v403_v22 = vsub.f32 1.0, %v402_v20 }
 0x234   :  { %v427_v41 = vor.u32 1.1754944e-38, %v426_v36  ;;  %vm425_vm8 = vcmp.eq.f32.partialorder %v424_v38, 8.507059e+37 }
 0x235   :  { %v404_v24 = vmul.f32 %v506_v19, %v403_v22 }
 0x237   :  { %v405_v26 = vadd.f32 %v506_v19, %v404_v24 }
 0x238   :  { %v508_v27 = vpop.eup %507  ;;  %v329_v32 = vpop.f32.mrf.mxu2 }
 0x239   :  { %v416_v29 = vmul.f32 %v508_v27, %v298_v21  ;;  %v409_v30 = vsel %vm408_vm3, %v506_v19, %v405_v26  ;;  %v301_v31 = vpop.xlane.xlu0 %300  ;;  %vm421_vm5 = vweird.f32 %v508_v27 }
 0x23a   :  { %v414_v33 = vsel %vm411_vm4, %v413_v28, %v409_v30  ;;  %509 = vrcp.f32 %v301_v31  ;;  %vm422_vm7 = vmor %vm420_vm6, %vm421_vm5  ;;  %v440_v49 = vand.u32 2147483648, %v301_v31  ;;  %v438_v51 = vand.u32 2147483647, %v301_v31 }
 0x23b   :  { %v417_v34 = vsub.f32 1.0, %v416_v29  ;;  %v457_v35 = vmul.f32 %v414_v33, %v329_v32  ;;  %vm434_vm10 = vweird.f32 %v301_v31 }
 0x23c   :  { %v441_v54 = vor.u32 1.1754944e-38, %v440_v49  ;;  %vm439_vm12 = vcmp.eq.f32.partialorder %v438_v51, 8.507059e+37 }
 0x23d   :  { %v418_v37 = vmul.f32 %v508_v27, %v417_v34  ;;  %461 = vst [vmem:[#allocation9] sm:$0xff] %v457_v35 }
 0x23f   :  { %v419_v39 = vadd.f32 %v508_v27, %v418_v37 }
 0x240   :  { %v510_v40 = vpop.eup %509  ;;  %v352_v45 = vpop.f32.mrf.mxu3 }
 0x241   :  { %v430_v42 = vmul.f32 %v510_v40, %v301_v31  ;;  %v423_v43 = vsel %vm422_vm7, %v508_v27, %v419_v39  ;;  %v304_v44 = vpop.xlane.xlu1 %303  ;;  %vm435_vm9 = vweird.f32 %v510_v40 }
 0x242   :  { %v428_v46 = vsel %vm425_vm8, %v427_v41, %v423_v43  ;;  %511 = vrcp.f32 %v304_v44  ;;  %vm436_vm11 = vmor %vm434_vm10, %vm435_vm9  ;;  %v454_v61 = vand.u32 2147483648, %v304_v44  ;;  %v452_v63 = vand.u32 2147483647, %v304_v44 }
 0x243   :  { %v431_v47 = vsub.f32 1.0, %v430_v42  ;;  %v458_v48 = vmul.f32 %v428_v46, %v352_v45  ;;  %vm448_vm14 = vweird.f32 %v304_v44 }
 0x244   :  { %v455_v1 = vor.u32 1.1754944e-38, %v454_v61  ;;  %vm453_vm0 = vcmp.eq.f32.partialorder %v452_v63, 8.507059e+37 }
 0x245   :  { %v432_v50 = vmul.f32 %v510_v40, %v431_v47  ;;  %462 = vst [vmem:[#allocation9 + $0x8] sm:$0xff] %v458_v48 }
 0x247   :  { %v433_v52 = vadd.f32 %v510_v40, %v432_v50 }
 0x248   :  { %v512_v53 = vpop.eup %511  ;;  %v375_v57 = vpop.f32.mrf.mxu2 }
 0x249   :  { %v444_v55 = vmul.f32 %v512_v53, %v304_v44  ;;  %v437_v56 = vsel %vm436_vm11, %v510_v40, %v433_v52  ;;  %vm449_vm13 = vweird.f32 %v512_v53 }
 0x24a   :  { %v442_v58 = vsel %vm439_vm12, %v441_v54, %v437_v56  ;;  %vm450_vm15 = vmor %vm448_vm14, %vm449_vm13 }
 0x24b   :  { %v445_v59 = vsub.f32 1.0, %v444_v55  ;;  %v459_v60 = vmul.f32 %v442_v58, %v375_v57 }
 0x24d   :  { %v446_v62 = vmul.f32 %v512_v53, %v445_v59  ;;  %463 = vst [vmem:[#allocation9 + $0x10] sm:$0xff] %v459_v60 }
 0x24f   :  { %v447_v0 = vadd.f32 %v512_v53, %v446_v62 }
 0x250   :  { %v398_v3 = vpop.f32.mrf.mxu3 }
 0x251   :  { %v451_v2 = vsel %vm450_vm15, %v512_v53, %v447_v0 }
 0x252   :  { %v456_v4 = vsel %vm453_vm0, %v455_v1, %v451_v2 }
 0x253   :  { %v460_v5 = vmul.f32 %v456_v4, %v398_v3 }
 0x255   :  { %464 = vst [vmem:[#allocation9 + $0x18] sm:$0xff] %v460_v5 }
 0x256   :  { %477 = dma.vmem_to_hbm [thread:$0]  %s470_s4, 512, %s472_s13, [#allocation5], %s616_s26, %s616_s26, %s617_s27  }
 0x257   :  { %613 = dma.done.wait [#allocation5], 512  }
 0x258   :  { %614 = vsyncadd [#allocation5], 4294966784 }
 0x259   :  { %482 = vsyncpa [#allocation4], 1 }
 0x25a   :  { %483 = vsyncpa [#allocation7], 1 }
 0x25b   :  { %484 = vsyncpa [#allocation5], 1 }

</bundles_post_ra>
